<compile_context>
chip_gen: v6e
topology: v6e:2x2x1
jax: 0.10.0
libtpu: 0.0.40
codegen_flags: <defaults>
</compile_context>

<pallas_src>
import functools

import jax
import jax.numpy as jnp
from jax import lax
from jax.experimental import pallas as pl
from jax.experimental.pallas import tpu as pltpu


def _round_up(x, m):
    return ((x + m - 1) // m) * m


def _v2e_kernel(adj_ref, x_ref, w_ref, b_ref, o_ref, acc_ref, norm_ref):
    """adj_ref: [tm, tk] int8, x_ref: [tk, Fp] f32, w_ref: [Fp, Fp] f32,
    b_ref: [1, Fp] f32, o_ref: [tm, Fp], acc_ref: [tm, Fp] f32, norm_ref: [tm,1]."""
    k = pl.program_id(1)

    @pl.when(k == 0)
    def _init():
        acc_ref[...] = jnp.zeros_like(acc_ref)
        norm_ref[...] = jnp.zeros_like(norm_ref)

    # int8 tile -> {0,1} f32 mask on the VPU (exact: values are integers)
    adj = adj_ref[...].astype(jnp.float32)
    mask = jnp.where(adj == -1.0, 1.0, 0.0).astype(jnp.float32)   # [tm, tk]

    # partial row-degree and partial mask @ x (MXU, f32 accumulation)
    norm_ref[...] += jnp.sum(mask, axis=-1, keepdims=True)
    acc_ref[...] += jnp.dot(mask, x_ref[...],
                            preferred_element_type=jnp.float32)

    @pl.when(k == pl.num_programs(1) - 1)
    def _finalize():
        norm = norm_ref[...]
        norm = jnp.where(norm == 0.0, 1.0, norm)
        # E x 1 reciprocal + broadcast-mul instead of an E x F divide
        msg = acc_ref[...] * pl.reciprocal(norm, approx=False)     # [tm, Fp]
        # msg @ W^T without materializing W^T: contract dim 1 of both operands
        z = lax.dot_general(msg, w_ref[...],
                            dimension_numbers=(((1,), (1,)), ((), ())),
                            preferred_element_type=jnp.float32)
        z = z + b_ref[...]
        o_ref[...] = jnp.maximum(z, 0.0).astype(o_ref.dtype)


@functools.partial(jax.jit, static_argnames=())
def vertex2hyperedge_pallas(node_embeddings, adj, weight, bias):
    """node_embeddings: [V, F], adj: [E, V] with entries in {-1,0,1},
    weight: [F, F] (PyTorch Linear convention y = x @ W^T + b), bias: [F].
    Returns relu((mask @ x)/norm @ W^T + b) of shape [E, F]."""
    E, V = adj.shape
    Vx, F = node_embeddings.shape
    assert V == Vx

    # Lane-dense, MXU-friendly padded shapes / tile sizes.
    F_pad = _round_up(F, 128)
    tm = min(128, _round_up(E, 32))          # int8 adj needs sublane mult. of 32
    E_pad = _round_up(E, tm)
    tk = min(512, _round_up(V, 128))
    V_pad = _round_up(V, tk)

    # Zero padding is semantics-preserving: padded vertices have mask==0,
    # padded feature columns of x are 0, padded weight rows/cols are 0,
    # padded hyperedge rows are sliced off below.
    x_p = jnp.zeros((V_pad, F_pad), jnp.float32)
    x_p = x_p.at[:V, :F].set(node_embeddings.astype(jnp.float32))
    adj_p = jnp.zeros((E_pad, V_pad), jnp.int8)
    adj_p = adj_p.at[:E, :V].set(adj.astype(jnp.int8))
    w_p = jnp.zeros((F_pad, F_pad), jnp.float32)
    w_p = w_p.at[:F, :F].set(weight.astype(jnp.float32))
    b_p = jnp.zeros((1, F_pad), jnp.float32)
    b_p = b_p.at[0, :F].set(bias.astype(jnp.float32))

    grid = (E_pad // tm, V_pad // tk)

    out = pl.pallas_call(
        _v2e_kernel,
        out_shape=jax.ShapeDtypeStruct((E_pad, F_pad), jnp.float32),
        grid=grid,
        in_specs=[
            pl.BlockSpec((tm, tk), lambda i, k: (i, k)),        # adj tile (int8)
            pl.BlockSpec((tk, F_pad), lambda i, k: (k, 0)),     # x tile
            pl.BlockSpec((F_pad, F_pad), lambda i, k: (0, 0)),  # weight (resident)
            pl.BlockSpec((1, F_pad), lambda i, k: (0, 0)),      # bias (resident)
        ],
        out_specs=pl.BlockSpec((tm, F_pad), lambda i, k: (i, 0)),
        scratch_shapes=[
            pltpu.VMEM((tm, F_pad), jnp.float32),               # msg accumulator
            pltpu.VMEM((tm, 1), jnp.float32),                   # norm accumulator
        ],
        compiler_params=pltpu.CompilerParams(
            dimension_semantics=("parallel", "arbitrary"),
            # conservative scoped-VMEM budget that is valid on v5e/v6e/v7x
            vmem_limit_bytes=32 * 1024 * 1024,
        ),
    )(adj_p, x_p, w_p, b_p)

    return out[:E, :F]


def vertex2hyperedge_ref(node_embeddings, adj, weight, bias):
    """Pure-JAX reference mirroring the PyTorch forward."""
    adj_target = jnp.where(adj == -1, 1.0, 0.0).astype(jnp.float32)
    norm = jnp.sum(adj_target, axis=-1, keepdims=True)
    norm = jnp.where(norm == 0.0, 1.0, norm)
    msg = (adj_target @ node_embeddings.astype(jnp.float32)) / norm
    return jax.nn.relu(msg @ weight.T + bias)


if __name__ == "__main__":
    key = jax.random.PRNGKey(0)
    k1, k2, k3, k4 = jax.random.split(key, 4)

    n_features = 32
    n_vertices = 16
    n_edges = 8

    node_embeddings = jax.random.normal(k1, (n_vertices, n_features),
                                        dtype=jnp.float32)
    # adjacency entries in {-1, 0, 1}: -1 marks source vertices of a hyperedge
    adj = jax.random.randint(k2, (n_edges, n_vertices), -1, 2).astype(jnp.int8)

    # deterministic Linear params (n_features -> n_features, with bias)
    weight = jax.random.normal(k3, (n_features, n_features),
                               dtype=jnp.float32) * 0.1
    bias = jax.random.normal(k4, (n_features,), dtype=jnp.float32) * 0.1

    out = vertex2hyperedge_pallas(node_embeddings, adj, weight, bias)
    out = jax.block_until_ready(out)

    ref = vertex2hyperedge_ref(node_embeddings, adj, weight, bias)
    assert out.shape == (n_edges, n_features)
    assert jnp.allclose(out, ref, atol=1e-5, rtol=1e-5), "mismatch vs reference"
    print("KERNEL_OK")
</pallas_src>

<mosaic_0001>
module attributes {stable_mosaic.version = 11 : i64} {
  func.func @_v2e_kernel(%arg0: i32, %arg1: i32, %arg2: memref<32x128xi8, #tpu.memory_space<vmem>>, %arg3: memref<128x128xf32, #tpu.memory_space<vmem>>, %arg4: memref<128x128xf32, #tpu.memory_space<vmem>>, %arg5: memref<1x128xf32, #tpu.memory_space<vmem>>, %arg6: memref<32x128xf32, #tpu.memory_space<vmem>>, %arg7: memref<32x128xf32, #tpu.memory_space<vmem>>, %arg8: memref<32x1xf32, #tpu.memory_space<vmem>>) attributes {dimension_semantics = [#tpu.dimension_semantics<parallel>, #tpu.dimension_semantics<arbitrary>], iteration_bounds = array<i64: 1, 1>, scalar_prefetch = 0 : i64, scratch_operands = 2 : i64, tpu.core_type = #tpu.core_type<tc>, window_params = [{transform_indices = @transform_0, window_bounds = array<i64: 32, 128>}, {transform_indices = @transform_1, window_bounds = array<i64: 128, 128>}, {pipeline_mode = #tpu.pipeline_mode<synchronous>, transform_indices = @transform_2, window_bounds = array<i64: 128, 128>}, {pipeline_mode = #tpu.pipeline_mode<synchronous>, transform_indices = @transform_3, window_bounds = array<i64: 1, 128>}, {transform_indices = @transform_4, window_bounds = array<i64: 32, 128>}]} {
    %c0_i32 = arith.constant 0 : i32
    %0 = arith.cmpi eq, %arg1, %c0_i32 : i32
    %1 = arith.extui %0 : i1 to i32
    %c0_i32_0 = arith.constant 0 : i32
    %2 = arith.cmpi ne, %1, %c0_i32_0 : i32
    scf.if %2 {
      %cst_18 = arith.constant 0.000000e+00 : f32
      %23 = vector.broadcast %cst_18 : f32 to vector<32x128xf32>
      %c0_19 = arith.constant 0 : index
      %c0_20 = arith.constant 0 : index
      %24 = vector.load %arg7[%c0_19, %c0_20] : memref<32x128xf32, #tpu.memory_space<vmem>>, vector<32x128xf32>
      tpu.vector_store %arg7[%c0_19, %c0_20], %23 {strides = array<i32>} : memref<32x128xf32, #tpu.memory_space<vmem>>, vector<32x128xf32>,
      %cst_21 = arith.constant 0.000000e+00 : f32
      %25 = vector.broadcast %cst_21 : f32 to vector<32x1xf32>
      %c0_22 = arith.constant 0 : index
      %c0_23 = arith.constant 0 : index
      %26 = vector.load %arg8[%c0_22, %c0_23] : memref<32x1xf32, #tpu.memory_space<vmem>>, vector<32x1xf32>
      tpu.vector_store %arg8[%c0_22, %c0_23], %25 {strides = array<i32>} : memref<32x1xf32, #tpu.memory_space<vmem>>, vector<32x1xf32>,
    } else {
    }
    %c0 = arith.constant 0 : index
    %c0_1 = arith.constant 0 : index
    %3 = vector.load %arg2[%c0, %c0_1] : memref<32x128xi8, #tpu.memory_space<vmem>>, vector<32x128xi8>
    %4 = arith.sitofp %3 : vector<32x128xi8> to vector<32x128xf32>
    %cst = arith.constant -1.000000e+00 : f32
    %5 = vector.broadcast %cst : f32 to vector<32x128xf32>
    %6 = arith.cmpf oeq, %4, %5 : vector<32x128xf32>
    %cst_2 = arith.constant 1.000000e+00 : f32
    %cst_3 = arith.constant 0.000000e+00 : f32
    %7 = vector.broadcast %cst_2 : f32 to vector<32x128xf32>
    %8 = vector.broadcast %cst_3 : f32 to vector<32x128xf32>
    %9 = arith.select %6, %7, %8 : vector<32x128xi1>, vector<32x128xf32>
    %c0_4 = arith.constant 0 : index
    %c0_5 = arith.constant 0 : index
    %10 = vector.load %arg8[%c0_4, %c0_5] : memref<32x1xf32, #tpu.memory_space<vmem>>, vector<32x1xf32>
    %cst_6 = arith.constant dense<0.000000e+00> : vector<32xf32>
    %11 = vector.multi_reduction <add>, %9, %cst_6 [1] : vector<32x128xf32> to vector<32xf32>
    %12 = vector.shape_cast %11 : vector<32xf32> to vector<32x1xf32>
    %13 = arith.addf %10, %12 : vector<32x1xf32>
    %c0_7 = arith.constant 0 : index
    %c0_8 = arith.constant 0 : index
    %14 = vector.load %arg8[%c0_7, %c0_8] : memref<32x1xf32, #tpu.memory_space<vmem>>, vector<32x1xf32>
    tpu.vector_store %arg8[%c0_7, %c0_8], %13 {strides = array<i32>} : memref<32x1xf32, #tpu.memory_space<vmem>>, vector<32x1xf32>,
    %c0_9 = arith.constant 0 : index
    %c0_10 = arith.constant 0 : index
    %15 = vector.load %arg7[%c0_9, %c0_10] : memref<32x128xf32, #tpu.memory_space<vmem>>, vector<32x128xf32>
    %c0_11 = arith.constant 0 : index
    %c0_12 = arith.constant 0 : index
    %16 = vector.load %arg3[%c0_11, %c0_12] : memref<128x128xf32, #tpu.memory_space<vmem>>, vector<128x128xf32>
    %cst_13 = arith.constant dense<0.000000e+00> : vector<32x128xf32>
    %17 = tpu.matmul %9, %16, %cst_13 {dimension_numbers = #tpu.dot_dimension_numbers<[1], [0], [0], [1], [0, 0, 1, 1], [], []>} : vector<32x128xf32>, vector<128x128xf32>, vector<32x128xf32> -> vector<32x128xf32>
    %18 = arith.addf %15, %17 : vector<32x128xf32>
    %c0_14 = arith.constant 0 : index
    %c0_15 = arith.constant 0 : index
    %19 = vector.load %arg7[%c0_14, %c0_15] : memref<32x128xf32, #tpu.memory_space<vmem>>, vector<32x128xf32>
    tpu.vector_store %arg7[%c0_14, %c0_15], %18 {strides = array<i32>} : memref<32x128xf32, #tpu.memory_space<vmem>>, vector<32x128xf32>,
    %c0_i32_16 = arith.constant 0 : i32
    %20 = arith.cmpi eq, %arg1, %c0_i32_16 : i32
    %21 = arith.extui %20 : i1 to i32
    %c0_i32_17 = arith.constant 0 : i32
    %22 = arith.cmpi ne, %21, %c0_i32_17 : i32
    scf.if %22 {
      %c0_18 = arith.constant 0 : index
      %c0_19 = arith.constant 0 : index
      %23 = vector.load %arg8[%c0_18, %c0_19] : memref<32x1xf32, #tpu.memory_space<vmem>>, vector<32x1xf32>
      %cst_20 = arith.constant 0.000000e+00 : f32
      %24 = vector.broadcast %cst_20 : f32 to vector<32x1xf32>
      %25 = arith.cmpf oeq, %23, %24 : vector<32x1xf32>
      %cst_21 = arith.constant 1.000000e+00 : f32
      %26 = vector.broadcast %cst_21 : f32 to vector<32x1xf32>
      %27 = arith.select %25, %26, %23 : vector<32x1xi1>, vector<32x1xf32>
      %c0_22 = arith.constant 0 : index
      %c0_23 = arith.constant 0 : index
      %28 = vector.load %arg7[%c0_22, %c0_23] : memref<32x128xf32, #tpu.memory_space<vmem>>, vector<32x128xf32>
      %29 = tpu.reciprocal %27 : vector<32x1xf32> -> vector<32x1xf32>
      %30 = vector.broadcast %29 : vector<32x1xf32> to vector<32x128xf32>
      %31 = arith.mulf %28, %30 : vector<32x128xf32>
      %c0_24 = arith.constant 0 : index
      %c0_25 = arith.constant 0 : index
      %32 = vector.load %arg4[%c0_24, %c0_25] : memref<128x128xf32, #tpu.memory_space<vmem>>, vector<128x128xf32>
      %cst_26 = arith.constant dense<0.000000e+00> : vector<32x128xf32>
      %33 = tpu.matmul %31, %32, %cst_26 {dimension_numbers = #tpu.dot_dimension_numbers<[1], [1], [0], [0], [0, 0, 1, 0], [], []>} : vector<32x128xf32>, vector<128x128xf32>, vector<32x128xf32> -> vector<32x128xf32>
      %c0_27 = arith.constant 0 : index
      %c0_28 = arith.constant 0 : index
      %34 = vector.load %arg5[%c0_27, %c0_28] : memref<1x128xf32, #tpu.memory_space<vmem>>, vector<1x128xf32>
      %35 = vector.broadcast %34 : vector<1x128xf32> to vector<32x128xf32>
      %36 = arith.addf %33, %35 : vector<32x128xf32>
      %cst_29 = arith.constant 0.000000e+00 : f32
      %37 = vector.broadcast %cst_29 : f32 to vector<32x128xf32>
      %38 = arith.maximumf %36, %37 : vector<32x128xf32>
      %c0_30 = arith.constant 0 : index
      %c0_31 = arith.constant 0 : index
      %39 = vector.load %arg6[%c0_30, %c0_31] : memref<32x128xf32, #tpu.memory_space<vmem>>, vector<32x128xf32>
      tpu.vector_store %arg6[%c0_30, %c0_31], %38 {strides = array<i32>} : memref<32x128xf32, #tpu.memory_space<vmem>>, vector<32x128xf32>,
    } else {
    }
    return
  }
  func.func @transform_0(%arg0: i32, %arg1: i32) -> (i32, i32) {
    %c0_i32 = arith.constant 0 : i32
    return %arg0, %arg1 : i32, i32
  }
  func.func @transform_1(%arg0: i32, %arg1: i32) -> (i32, i32) {
    %c0_i32 = arith.constant 0 : i32
    %c0_i32_0 = arith.constant 0 : i32
    return %arg1, %c0_i32 : i32, i32
  }
  func.func @transform_2(%arg0: i32, %arg1: i32) -> (i32, i32) {
    %c0_i32 = arith.constant 0 : i32
    %c0_i32_0 = arith.constant 0 : i32
    %c0_i32_1 = arith.constant 0 : i32
    return %c0_i32, %c0_i32_0 : i32, i32
  }
  func.func @transform_3(%arg0: i32, %arg1: i32) -> (i32, i32) {
    %c0_i32 = arith.constant 0 : i32
    %c0_i32_0 = arith.constant 0 : i32
    %c0_i32_1 = arith.constant 0 : i32
    return %c0_i32, %c0_i32_0 : i32, i32
  }
  func.func @transform_4(%arg0: i32, %arg1: i32) -> (i32, i32) {
    %c0_i32 = arith.constant 0 : i32
    %c0_i32_0 = arith.constant 0 : i32
    return %arg0, %c0_i32 : i32, i32
  }
}

</mosaic_0001>

<bundles_post_ra>
// kernel: vertex2hyperedge_pallas.1
= control target key start
LH: loop header
LB: loop body
LE: loop exit
PB: predicated region body
PF: predicated region fallthrough
CT: control target
= control target key end

     0   :  { %vm25_vm0 = vcmask 7168   ;;  %v482_v3 = vmov 0.0   ;;  %v483_v16 = vmov 1.0   ;;  %v484_v28 = vmov 0   ;;  %s653_s0 = inlined_call_operand.vmem [shape: s8[32,128], index: 0, kind: input, shape index: {}]   ;;  %s654_s1 = inlined_call_operand.vmem [shape: f32[128,128], index: 1, kind: input, shape index: {}]   ;;  %s655_s2 = inlined_call_operand.vmem [shape: f32[128,128], index: 2, kind: input, shape index: {}]   ;;  %s656_s3 = inlined_call_operand.vmem [shape: f32[1,128], index: 3, kind: input, shape index: {}]   ;;  %s657_s4 = inlined_call_operand.vmem [shape: f32[32,128], index: 4, kind: output, shape index: {}]  }
   0x1   :  { %v30_v0 = vld [vmem:[%s653_s0] sm:$0xff]  ;;  %v87_v1 = vld [vmem:[%s654_s1 + $0x78] sm:$0xff]  ;;  %v86_v2 = vld [vmem:[%s654_s1 + $0x70] sm:$0xff]  ;;  %26 = vst.msk [vmem:[#allocation3] sm:$0xff] %vm25_vm0, %v482_v3  ;;  %472 = vset.pattern.permute.xlu0 %v484_v28  ;;  %473 = vset.pattern.permute.xlu1 %v484_v28 }
   0x2   :  { %27 = vst.msk [vmem:[#allocation3 + $0x8] sm:$0xff] %vm25_vm0, %v482_v3  ;;  %28 = vst.msk [vmem:[#allocation3 + $0x10] sm:$0xff] %vm25_vm0, %v482_v3  ;;  %v31_v4 = vunpack.c.0.s8 %v30_v0  ;;  %v32_v5 = vunpack.c.1.s8 %v30_v0  ;;  %v33_v6 = vunpack.c.2.s8 %v30_v0  ;;  %v34_v7 = vunpack.c.3.s8 %v30_v0  ;;  %393 = vmatprep.subr.mxu0 %v87_v1  ;;  %v85_v8 = vld [vmem:[%s654_s1 + $0x68] sm:$0xff]  ;;  %v84_v13 = vld [vmem:[%s654_s1 + $0x60] sm:$0xff] }
   0x3   :  { %29 = vst.msk [vmem:[#allocation3 + $0x18] sm:$0xff] %vm25_vm0, %v482_v3  ;;  %394 = vmatpush3.msra.mxu0 %v87_v1  ;;  %v83_v17 = vld [vmem:[%s654_s1 + $0x58] sm:$0xff]  ;;  %v82_v20 = vld [vmem:[%s654_s1 + $0x50] sm:$0xff]  ;;  %v81_v21 = vld [vmem:[%s654_s1 + $0x48] sm:$0xff] }
   0x4   :  { %v35_v9 = vcvt.s32.f32 %v31_v4  ;;  %v526_v10 = vcvt.s32.f32 %v32_v5  ;;  %v528_v11 = vcvt.s32.f32 %v33_v6  ;;  %v530_v12 = vcvt.s32.f32 %v34_v7  ;;  %395 = vmatprep.subr.mxu0 %v86_v2  ;;  %v80_v22 = vld [vmem:[%s654_s1 + $0x40] sm:$0xff]  ;;  %v79_v23 = vld [vmem:[%s654_s1 + $0x38] sm:$0xff]  ;;  %v78_v24 = vld [vmem:[%s654_s1 + $0x30] sm:$0xff] }
   0x5   :  { %396 = vmatpush3.msra.mxu0 %v86_v2  ;;  %v77_v25 = vld [vmem:[%s654_s1 + $0x28] sm:$0xff]  ;;  %v76_v26 = vld [vmem:[%s654_s1 + $0x20] sm:$0xff]  ;;  %v75_v27 = vld [vmem:[%s654_s1 + $0x18] sm:$0xff] }
   0x6   :  { %vm39_vm1 = vcmp.eq.f32.partialorder %v35_v9, -1.0  ;;  %vm40_vm2 = vcmp.eq.f32.partialorder %v526_v10, -1.0  ;;  %vm41_vm3 = vcmp.eq.f32.partialorder %v528_v11, -1.0  ;;  %vm42_vm4 = vcmp.eq.f32.partialorder %v530_v12, -1.0  ;;  %397 = vmatprep.subr.mxu0 %v85_v8  ;;  %v74_v29 = vld [vmem:[%s654_s1 + $0x10] sm:$0xff]  ;;  %v73_v30 = vld [vmem:[%s654_s1 + $0x8] sm:$0xff] }
   0x7   :  { %v43_v14 = vsel %vm39_vm1, 1.0, %v482_v3  ;;  %v45_v15 = vsel %vm41_vm3, 1.0, %v482_v3  ;;  %398 = vmatpush3.msra.mxu0 %v85_v8  ;;  %425 = vmatprep.mubr.msk.f32.mxu0 %vm39_vm1, %v483_v16  ;;  %v44_v18 = vsel %vm40_vm2, 1.0, %v482_v3  ;;  %v46_v19 = vsel %vm42_vm4, 1.0, %v482_v3  ;;  %v72_v31 = vld [vmem:[%s654_s1] sm:$0xff]  ;;  %v243_v32 = vld [vmem:[%s655_s2 + $0x78] sm:$0xff] }
   0x8   :  { %51 = vadd.xlane.f32.xlu0 %v43_v14  ;;  %55 = vadd.xlane.f32.xlu1 %v45_v15  ;;  %v242_v33 = vld [vmem:[%s655_s2 + $0x70] sm:$0xff]  ;;  %v241_v34 = vld [vmem:[%s655_s2 + $0x68] sm:$0xff]  ;;  %v240_v35 = vld [vmem:[%s655_s2 + $0x60] sm:$0xff] }
   0x9   :  { %399 = vmatprep.subr.mxu0 %v84_v13  ;;  %431 = vmatprep.subr.mxu1 %v243_v32  ;;  %v239_v36 = vld [vmem:[%s655_s2 + $0x58] sm:$0xff]  ;;  %v238_v37 = vld [vmem:[%s655_s2 + $0x50] sm:$0xff]  ;;  %v237_v38 = vld [vmem:[%s655_s2 + $0x48] sm:$0xff] }
   0xa   :  { %400 = vmatpush3.msra.mxu0 %v84_v13  ;;  %432 = vmatpush3.xpose.msra.mxu1 %v243_v32  ;;  %v236_v39 = vld [vmem:[%s655_s2 + $0x40] sm:$0xff]  ;;  %v235_v40 = vld [vmem:[%s655_s2 + $0x38] sm:$0xff]  ;;  %v234_v41 = vld [vmem:[%s655_s2 + $0x30] sm:$0xff] }
   0xb   :  { %401 = vmatprep.subr.mxu0 %v83_v17  ;;  %433 = vmatprep.subr.mxu1 %v242_v33  ;;  %v233_v42 = vld [vmem:[%s655_s2 + $0x28] sm:$0xff]  ;;  %v232_v43 = vld [vmem:[%s655_s2 + $0x20] sm:$0xff]  ;;  %v231_v44 = vld [vmem:[%s655_s2 + $0x18] sm:$0xff] }
   0xc   :  { %53 = vadd.xlane.f32.xlu0 %v44_v18  ;;  %57 = vadd.xlane.f32.xlu1 %v46_v19  ;;  %v230_v45 = vld [vmem:[%s655_s2 + $0x10] sm:$0xff]  ;;  %v229_v46 = vld [vmem:[%s655_s2 + $0x8] sm:$0xff]  ;;  %v47_v47 = vld [vmem:[#allocation3] sm:$0xff] }
   0xd   :  { %402 = vmatpush3.msra.mxu0 %v83_v17  ;;  %v49_v48 = vld [vmem:[#allocation3 + $0x10] sm:$0xff]  ;;  %v48_v53 = vld [vmem:[#allocation3 + $0x8] sm:$0xff]  ;;  %v50_v54 = vld [vmem:[#allocation3 + $0x18] sm:$0xff] }
   0xe   :  { %403 = vmatprep.subr.mxu0 %v82_v20  ;;  %434 = vmatpush3.xpose.msra.mxu1 %v242_v33  ;;  %v228_v3 = vld [vmem:[%s655_s2] sm:$0xff] }
   0xf   :  { %404 = vmatpush3.msra.mxu0 %v82_v20  ;;  %435 = vmatprep.subr.mxu1 %v241_v34  ;;  %v352_v20 = vld [vmem:[%s656_s3] ss:$0 sm:$0xff] }
  0x10   :  { %405 = vmatprep.subr.mxu0 %v81_v21 }
  0x11   :  { %406 = vmatpush3.msra.mxu0 %v81_v21 }
  0x12   :  { %407 = vmatprep.subr.mxu0 %v80_v22  ;;  %436 = vmatpush3.xpose.msra.mxu1 %v241_v34 }
  0x13   :  { %408 = vmatpush3.msra.mxu0 %v80_v22  ;;  %437 = vmatprep.subr.mxu1 %v240_v35 }
  0x14   :  { %409 = vmatprep.subr.mxu0 %v79_v23 }
  0x15   :  { %410 = vmatpush3.msra.mxu0 %v79_v23 }
  0x16   :  { %411 = vmatprep.subr.mxu0 %v78_v24  ;;  %438 = vmatpush3.xpose.msra.mxu1 %v240_v35 }
  0x17   :  { %412 = vmatpush3.msra.mxu0 %v78_v24  ;;  %439 = vmatprep.subr.mxu1 %v239_v36 }
  0x18   :  { %413 = vmatprep.subr.mxu0 %v77_v25 }
  0x19   :  { %414 = vmatpush3.msra.mxu0 %v77_v25 }
  0x1a   :  { %415 = vmatprep.subr.mxu0 %v76_v26  ;;  %440 = vmatpush3.xpose.msra.mxu1 %v239_v36 }
  0x1b   :  { %416 = vmatpush3.msra.mxu0 %v76_v26  ;;  %441 = vmatprep.subr.mxu1 %v238_v37 }
  0x1c   :  { %417 = vmatprep.subr.mxu0 %v75_v27 }
  0x1d   :  { %418 = vmatpush3.msra.mxu0 %v75_v27 }
  0x1e   :  { %419 = vmatprep.subr.mxu0 %v74_v29  ;;  %442 = vmatpush3.xpose.msra.mxu1 %v238_v37 }
  0x1f   :  { %420 = vmatpush3.msra.mxu0 %v74_v29  ;;  %443 = vmatprep.subr.mxu1 %v237_v38 }
  0x20   :  { %421 = vmatprep.subr.mxu0 %v73_v30 }
  0x21   :  { %422 = vmatpush3.msra.mxu0 %v73_v30 }
  0x22   :  { %423 = vmatprep.subr.mxu0 %v72_v31  ;;  %444 = vmatpush3.xpose.msra.mxu1 %v237_v38 }
  0x23   :  { %424 = vmatpush3.msra.mxu0 %v72_v31  ;;  %445 = vmatprep.subr.mxu1 %v236_v39 }
  0x24   :  { %426 = vmatmul.mubr.msk.f32.vlgmr.msra.gmra.mxu0 %vm40_vm2, %v483_v16 }
  0x25   :  { %428 = vmatprep.mubr.msk.f32.mxu0 %vm41_vm3, %v483_v16 }
  0x26   :  { %446 = vmatpush3.xpose.msra.mxu1 %v236_v39 }
  0x27   :  { %447 = vmatprep.subr.mxu1 %v235_v40 }
  0x28   :  { %429 = vmatmul.mubr.msk.f32.gmra.mxu0 %vm42_vm4, %v483_v16 }
  0x2a   :  { %448 = vmatpush3.xpose.msra.mxu1 %v235_v40 }
  0x2b   :  { %449 = vmatprep.subr.mxu1 %v234_v41 }
  0x2e   :  { %450 = vmatpush3.xpose.msra.mxu1 %v234_v41 }
  0x2f   :  { %451 = vmatprep.subr.mxu1 %v233_v42 }
  0x32   :  { %452 = vmatpush3.xpose.msra.mxu1 %v233_v42 }
  0x33   :  { %453 = vmatprep.subr.mxu1 %v232_v43 }
  0x36   :  { %454 = vmatpush3.xpose.msra.mxu1 %v232_v43 }
  0x37   :  { %455 = vmatprep.subr.mxu1 %v231_v44 }
  0x3a   :  { %456 = vmatpush3.xpose.msra.mxu1 %v231_v44 }
  0x3b   :  { %457 = vmatprep.subr.mxu1 %v230_v45 }
  0x3e   :  { %458 = vmatpush3.xpose.msra.mxu1 %v230_v45 }
  0x3f   :  { %459 = vmatprep.subr.mxu1 %v229_v46 }
  0x42   :  { %460 = vmatpush3.xpose.msra.mxu1 %v229_v46 }
  0x43   :  { %461 = vmatprep.subr.mxu1 %v228_v3 }
  0x46   :  { %462 = vmatpush3.xpose.msra.mxu1 %v228_v3 }
  0x91   :  { %v52_v49 = vpop.xlane.xlu0 %51  ;;  %v56_v50 = vpop.xlane.xlu1 %55 }
  0x92   :  { %v59_v51 = vadd.f32 %v52_v49, %v47_v47  ;;  %v61_v52 = vadd.f32 %v56_v50, %v49_v48 }
  0x94   :  { %64 = vst.msk [vmem:[#allocation3] sm:$0xff] %vm25_vm0, %v59_v51  ;;  %66 = vst.msk [vmem:[#allocation3 + $0x10] sm:$0xff] %vm25_vm0, %v61_v52 }
  0x95   :  { %v54_v55 = vpop.xlane.xlu0 %53  ;;  %v58_v56 = vpop.xlane.xlu1 %57 }
  0x96   :  { %v60_v57 = vadd.f32 %v54_v55, %v48_v53  ;;  %v62_v58 = vadd.f32 %v58_v56, %v50_v54 }
  0x98   :  { %65 = vst.msk [vmem:[#allocation3 + $0x8] sm:$0xff] %vm25_vm0, %v60_v57  ;;  %67 = vst.msk [vmem:[#allocation3 + $0x18] sm:$0xff] %vm25_vm0, %v62_v58 }
  0x9b   :  { %v184_v59 = vld [vmem:[#allocation3] sm:$0xff]  ;;  %v186_v60 = vld [vmem:[#allocation3 + $0x10] sm:$0xff] }
  0x9c   :  { %vm188_vm5 = vcmp.eq.f32.partialorder %v184_v59, 0.0  ;;  %vm190_vm6 = vcmp.eq.f32.partialorder %v186_v60, 0.0 }
  0x9d   :  { %v192_v61 = vsel %vm188_vm5, 1.0, %v184_v59  ;;  %v194_v1 = vsel %vm190_vm6, 1.0, %v186_v60 }
  0x9e   :  { %474 = vrcp.f32 %v192_v61 }
  0x9f   :  { %v185_v62 = vld [vmem:[#allocation3 + $0x8] sm:$0xff]  ;;  %v187_v63 = vld [vmem:[#allocation3 + $0x18] sm:$0xff] }
  0xa0   :  { %vm189_vm7 = vcmp.eq.f32.partialorder %v185_v62, 0.0  ;;  %vm191_vm8 = vcmp.eq.f32.partialorder %v187_v63, 0.0 }
  0xa1   :  { %v193_v0 = vsel %vm189_vm7, 1.0, %v185_v62  ;;  %v195_v2 = vsel %vm191_vm8, 1.0, %v187_v63 }
  0xa2   :  { %476 = vrcp.f32 %v193_v0 }
  0xa3   :  { %478 = vrcp.f32 %v194_v1 }
  0xa4   :  { %480 = vrcp.f32 %v195_v2 }
  0xab   :  { %v475_v4 = vpop.eup %474 }
  0xac   :  { %206 = vperm.xlu0 %472, %v475_v4  }
  0xaf   :  { %v477_v5 = vpop.eup %476 }
  0xb0   :  { %211 = vperm.xlu1 %473, %v477_v5   ;;  %v479_v6 = vpop.eup %478 }
  0xb1   :  { %v481_v7 = vpop.eup %480 }
  0xb4   :  { %216 = vperm.xlu1 %473, %v479_v6  }
  0xb8   :  { %221 = vperm.xlu1 %473, %v481_v7  }
  0xe4   :  { %v427_v8 = vpop.f32.mrf.mxu0 }
  0xe6   :  { %v154_v9 = vpop.f32.mrf.mxu0 }
  0xe8   :  { %v430_v12 = vpop.f32.mrf.mxu0 }
  0xea   :  { %v164_v15 = vpop.f32.mrf.mxu0 }
 0x127   :  { %v207_v10 = vpop.permute.xlu0 %206 }
 0x128   :  { %v224_v11 = vmul.f32 %v207_v10, %v154_v9 }
 0x12a   :  { %463 = vmatprep.mubr.f32.mxu1 %v224_v11 }
 0x12b   :  { %v212_v13 = vpop.permute.xlu1 %211 }
 0x12c   :  { %v225_v14 = vmul.f32 %v427_v8, %v212_v13 }
 0x12e   :  { %464 = vmatmul.mubr.f32.vlgmr.msra.gmra.mxu1 %v225_v14 }
 0x12f   :  { %v217_v16 = vpop.permute.xlu1 %216 }
 0x130   :  { %v226_v17 = vmul.f32 %v217_v16, %v164_v15 }
 0x132   :  { %466 = vmatprep.mubr.f32.mxu1 %v226_v17 }
 0x133   :  { %v222_v18 = vpop.permute.xlu1 %221 }
 0x134   :  { %v227_v19 = vmul.f32 %v430_v12, %v222_v18 }
 0x136   :  { %467 = vmatmul.mubr.f32.gmra.mxu1 %v227_v19 }
 0x1ee   :  { %v465_v21 = vpop.f32.mrf.mxu1 }
 0x1ef   :  { %v323_v22 = vadd.f32 %v465_v21, %v352_v20 }
 0x1f0   :  { %v317_v23 = vpop.f32.mrf.mxu1 }
 0x1f1   :  { %v337_v24 = vmax.f32 %v323_v22, 0.0  ;;  %v318_v25 = vadd.f32 %v352_v20, %v317_v23 }
 0x1f3   :  { %341 = vst [vmem:[%s657_s4 + $0x8] sm:$0xff] %v337_v24  ;;  %v336_v26 = vmax.f32 %v318_v25, 0.0 }
 0x1f5   :  { %340 = vst [vmem:[%s657_s4] sm:$0xff] %v336_v26 }
 0x1f6   :  { %v468_v27 = vpop.f32.mrf.mxu1 }
 0x1f7   :  { %v333_v28 = vadd.f32 %v468_v27, %v352_v20 }
 0x1f8   :  { %v327_v29 = vpop.f32.mrf.mxu1 }
 0x1f9   :  { %v339_v30 = vmax.f32 %v333_v28, 0.0  ;;  %v328_v31 = vadd.f32 %v352_v20, %v327_v29 }
 0x1fb   :  { %343 = vst [vmem:[%s657_s4 + $0x18] sm:$0xff] %v339_v30  ;;  %v338_v32 = vmax.f32 %v328_v31, 0.0 }
 0x1fd   :  { %342 = vst [vmem:[%s657_s4 + $0x10] sm:$0xff] %v338_v32 }

</bundles_post_ra>
